<compile_context>
chip_gen: v7x
topology: tpu7x:2x2x1
jax: 0.10.0
libtpu: 0.0.40
codegen_flags: <defaults>
</compile_context>

<pallas_src>
import inspect

import jax
import jax.numpy as jnp
from jax.experimental import pallas as pl
from jax.experimental.pallas import tpu as pltpu

_LN_EPS = 1e-5
_SQRT_HALF = 0.7071067811865476
_MiB = 1024 * 1024


def _round_up(x, m):
    return (x + m - 1) // m * m


def _detect_pipeline_mode():
    if not hasattr(pl, "Buffered"):
        return False
    try:
        return "pipeline_mode" in inspect.signature(pl.BlockSpec).parameters
    except (TypeError, ValueError):
        return False


_PIPELINE_MODE_SUPPORTED = _detect_pipeline_mode()


def _tpu_profile():
    """(vmem budget bytes, bf16-elementwise OK, is_v5e). Info query only."""
    kind = ""
    try:
        kind = jax.devices()[0].device_kind.lower()
    except Exception:  # device info unavailable -> conservative defaults
        pass
    vmem_bytes = 64 * _MiB
    try:
        vmem_bytes = int(pltpu.get_tpu_info().vmem_capacity_bytes)
    except Exception:  # older jax / no hw info -> assume the smallest real part
        pass
    budget = int(vmem_bytes * 0.85)  # ~54 MiB on v7x, ~108 MiB on 128 MiB parts
    bf16_elementwise = any(t in kind for t in ("v6", "v7"))  # bf16 VPU/EUP chips
    is_v5e = ("v5e" in kind) or ("v5 lite" in kind) or ("v5lite" in kind)
    return budget, bf16_elementwise, is_v5e


# ----------------------------- elementwise math ------------------------------

def _erf(x):
    # Abramowitz & Stegun 7.1.26 (|err| < 1.5e-7 in f32). Evaluated in x.dtype so
    # the VPU-bound GELUs can run in bf16 on v6e/v7x; the reciprocal goes to the
    # EUP (approx=True) in f32 for a safe lowering.
    a1, a2, a3, a4, a5 = (0.254829592, -0.284496736, 1.421413741,
                          -1.453152027, 1.061405429)
    p = 0.3275911
    z = jnp.abs(x)
    t = pl.reciprocal((1.0 + p * z).astype(jnp.float32), approx=True).astype(x.dtype)
    poly = ((((a5 * t + a4) * t + a3) * t + a2) * t + a1) * t
    y = 1.0 - poly * jnp.exp(-z * z)
    return jnp.where(x < 0.0, -y, y)


def _gelu_exact(x):
    # Exact (erf-based) GELU, matching PyTorch nn.GELU() default.
    return 0.5 * x * (1.0 + _erf(x * _SQRT_HALF))


def _gelu_tanh(x):
    # Optional cheaper tanh approximation (~1e-3 abs error vs exact nn.GELU()).
    c0, c1 = 0.7978845608028654, 0.044715
    return 0.5 * x * (1.0 + jnp.tanh(c0 * (x + c1 * x * x * x)))


# --------------------------------- kernel ------------------------------------

def _make_kernel(ew_dtype, use_tanh_gelu):
    gelu = _gelu_tanh if use_tanh_gelu else _gelu_exact

    def kernel(x_ref, w1_ref, b1_ref, w2_ref, b2_ref, wh_ref, bh_ref,
               o_ref, xn_ref, acc_ref):
        # Grid = (batch tile i, hidden chunk k); o_ref / scratch are resident over k.
        k = pl.program_id(1)

        @pl.when(k == 0)
        def _():
            # LayerNorm (f32, biased variance, eps inside rsqrt -> PyTorch
            # semantics). The affine is pre-folded into w1/b1, so only normalize.
            x = x_ref[...].astype(jnp.float32)
            mean = jnp.mean(x, axis=-1, keepdims=True)
            xc = x - mean
            var = jnp.mean(xc * xc, axis=-1, keepdims=True)
            xn_ref[...] = (xc * jax.lax.rsqrt(var + _LN_EPS)).astype(xn_ref.dtype)
            acc_ref[...] = jnp.zeros_like(acc_ref)

        # stem chunk: Linear -> GELU -> (Dropout: eval no-op) -> partial Linear
        h_pre = jnp.dot(xn_ref[...], w1_ref[...],
                        preferred_element_type=jnp.float32) + b1_ref[...]
        h = gelu(h_pre.astype(ew_dtype))
        acc_ref[...] += jnp.dot(h.astype(jnp.bfloat16), w2_ref[...],
                                preferred_element_type=jnp.float32)

        @pl.when(k == pl.num_programs(1) - 1)
        def _():
            z = gelu((acc_ref[...] + b2_ref[...]).astype(ew_dtype))
            # Fused heads: cols [0:P^2) = pos_head, [P^2:P^2+4) = rot_head, rest 0.
            out = jnp.dot(z.astype(jnp.bfloat16), wh_ref[...],
                          preferred_element_type=jnp.float32) + bh_ref[...]
            o_ref[...] = out.astype(o_ref.dtype)

    return kernel


# --------------------------- sizing / pallas_call ----------------------------

def _vmem_estimate(D, H, hk, n_pad, tb, x_isz, out_isz, single_buffer):
    n_chunks = H // hk
    wbuf = 1 if (n_chunks == 1 and single_buffer) else 2   # w1 / b1 / w2 buffers
    cbuf = 1 if single_buffer else 2                        # grid-constant blocks
    weights = wbuf * (2 * D * hk + 4 * hk + 2 * hk * D)     # w1, w2 bf16; b1 f32
    consts = cbuf * (4 * D + 2 * D * n_pad + 4 * n_pad)     # b2 f32; wh bf16; bh f32
    io = 2 * tb * D * x_isz + 2 * tb * n_pad * out_isz      # double-buffered x / out
    scratch = tb * D * (2 + 4)                              # xn bf16 + z acc f32
    interm = 2 * tb * max(hk, D, n_pad) * 4                 # live f32 temporaries
    return weights + consts + io + scratch + interm


def _choose_h_chunk(D, H, n_pad, tb, x_isz, out_isz, budget, single_buffer):
    if _vmem_estimate(D, H, H, n_pad, tb, x_isz, out_isz, single_buffer) <= budget:
        return H                      # fully-resident weights, single chunk
    hk = (H // 2) // 128 * 128
    while hk >= 128:
        if H % hk == 0 and _vmem_estimate(D, H, hk, n_pad, tb, x_isz, out_isz,
                                          single_buffer) <= budget:
            return hk
        hk -= 128
    # TODO(synk): no 128-aligned divisor of H fits the budget; fall back to the
    # fully-resident layout and rely on the raised vmem_limit.
    return H


def _build_call(B_pad, D, H, hk, n_pad, tb, store_dtype, ew_dtype,
                use_tanh_gelu, vmem_limit, single_buffer):
    n_chunks = H // hk
    const_kw = {"pipeline_mode": pl.Buffered(1)} if single_buffer else {}

    def const_spec(shape):   # grid-constant block: resident, single-buffered if possible
        return pl.BlockSpec(shape, lambda i, k: (0, 0), **const_kw)

    if n_chunks == 1:
        w1_spec = const_spec((D, hk))
        b1_spec = const_spec((1, hk))
        w2_spec = const_spec((hk, D))
    else:                    # chunked: these blocks move with k -> default pipelining
        w1_spec = pl.BlockSpec((D, hk), lambda i, k: (0, k))
        b1_spec = pl.BlockSpec((1, hk), lambda i, k: (0, k))
        w2_spec = pl.BlockSpec((hk, D), lambda i, k: (k, 0))

    return pl.pallas_call(
        _make_kernel(ew_dtype, use_tanh_gelu),
        out_shape=jax.ShapeDtypeStruct((B_pad, n_pad), store_dtype),
        grid_spec=pltpu.PrefetchScalarGridSpec(
            num_scalar_prefetch=0,
            grid=(B_pad // tb, n_chunks),
            in_specs=[
                pl.BlockSpec((tb, D), lambda i, k: (i, 0)),  # x tile (pipelined)
                w1_spec,                                     # ln_g-folded w1  (bf16)
                b1_spec,                                     # b1 + ln_b @ w1  (f32)
                w2_spec,                                     # w2              (bf16)
                const_spec((1, D)),                          # b2              (f32)
                const_spec((D, n_pad)),                      # [w_pos|w_rot|0] (bf16)
                const_spec((1, n_pad)),                      # [b_pos|b_rot|0] (f32)
            ],
            out_specs=pl.BlockSpec((tb, n_pad), lambda i, k: (i, 0)),
            scratch_shapes=[
                pltpu.VMEM((tb, D), jnp.bfloat16),   # LayerNorm output (matmul-ready)
                pltpu.VMEM((tb, D), jnp.float32),    # z accumulator over H chunks
            ],
        ),
        compiler_params=pltpu.CompilerParams(
            dimension_semantics=("parallel", "arbitrary"),
            vmem_limit_bytes=int(vmem_limit),
        ),
    )


# ------------------------------- public API ----------------------------------

def prepare_params(params):
    """One-time packing: fold the LN affine into linear-1, fuse pos/rot heads into
    a lane-dense (D, n_pad) projection, cast matmul weights to bf16. Call once and
    reuse the result so the packing is not re-paid every forward."""
    if params.get("_jigsaw_prepared", False):
        return params
    D, H = params["w1"].shape
    n_pos = int(params["w_pos"].shape[1])
    n_heads = n_pos + 4
    n_pad = _round_up(n_heads, 128)     # lane-dense fused-head width

    w1_f32 = params["w1"].astype(jnp.float32)
    ln_g = params["ln_g"].astype(jnp.float32)
    ln_b = params["ln_b"].astype(jnp.float32)
    w1 = (ln_g[:, None] * w1_f32).astype(jnp.bfloat16)            # exact LN fold
    b1 = (params["b1"].astype(jnp.float32) + ln_b @ w1_f32).reshape(1, H)

    w2 = params["w2"].astype(jnp.bfloat16)
    b2 = params["b2"].reshape(1, D).astype(jnp.float32)

    wh = jnp.zeros((D, n_pad), jnp.bfloat16)
    wh = wh.at[:, :n_pos].set(params["w_pos"].astype(jnp.bfloat16))
    wh = wh.at[:, n_pos:n_heads].set(params["w_rot"].astype(jnp.bfloat16))
    bh = jnp.zeros((1, n_pad), jnp.float32)
    bh = bh.at[:, :n_pos].set(params["b_pos"].astype(jnp.float32))
    bh = bh.at[:, n_pos:n_heads].set(params["b_rot"].astype(jnp.float32))

    return {"_jigsaw_prepared": True, "D": D, "H": H, "n_pos": n_pos, "n_pad": n_pad,
            "w1": w1, "b1": b1, "w2": w2, "b2": b2, "wh": wh, "bh": bh}


def jigsaw_multi_head_pallas(x, params, *, tb=None, h_chunk=None,
                             elementwise_dtype=None, use_tanh_gelu=False,
                             store_dtype=jnp.bfloat16):
    """Fused Pallas forward. Returns (pos_logits [..., P^2], rot_logits [..., 4]) in f32.
    `params` may be raw (init_params) or already prepared (prepare_params)."""
    prep = prepare_params(params)
    D, H, n_pos, n_pad = prep["D"], prep["H"], prep["n_pos"], prep["n_pad"]

    orig_lead = x.shape[:-1]
    x2 = x.reshape(-1, D)
    B = x2.shape[0]

    budget, bf16_ew, is_v5e = _tpu_profile()
    if elementwise_dtype is None:
        # v6e/v7x have bf16 VPU/EUP (2 elems per 32-bit lane) -> ~2x on the
        # VPU-bound GELUs; v5e keeps f32 elementwise math.
        elementwise_dtype = jnp.bfloat16 if bf16_ew else jnp.float32

    # Batch tile: keep grid >= ~4 so x/out DMAs pipeline against compute and the
    # "parallel" axis shards across both v7x TensorCores; on v5e (MXU-bound)
    # prefer full 128/256-row MXU passes over grid count.
    if tb is None:
        tb_cap = 256 if budget <= 64 * _MiB else 512
        tb = min(_round_up(max(8, pl.cdiv(B, 4)), 8), tb_cap)
        if is_v5e:
            tb = max(tb, min(256, _round_up(B, 8)))
    tb = max(8, _round_up(tb, 8))
    B_pad = _round_up(B, tb)
    x_p = x2 if B_pad == B else jnp.pad(x2, ((0, B_pad - B), (0, 0)))

    x_isz = jnp.dtype(x_p.dtype).itemsize
    out_isz = jnp.dtype(store_dtype).itemsize

    if h_chunk is not None and not (h_chunk == H or
                                    (H % h_chunk == 0 and h_chunk % 128 == 0)):
        raise ValueError(f"h_chunk={h_chunk} must divide H={H} and be a multiple of 128")

    def _run(single_buffer):
        hk = h_chunk if h_chunk is not None else _choose_h_chunk(
            D, H, n_pad, tb, x_isz, out_isz, budget, single_buffer)
        est = _vmem_estimate(D, H, hk, n_pad, tb, x_isz, out_isz, single_buffer)
        vmem_limit = min(budget, max(32 * _MiB, int(est * 1.25)))
        call = _build_call(B_pad, D, H, hk, n_pad, tb, store_dtype,
                           elementwise_dtype, use_tanh_gelu, vmem_limit, single_buffer)
        return call(x_p, prep["w1"], prep["b1"], prep["w2"], prep["b2"],
                    prep["wh"], prep["bh"])

    if _PIPELINE_MODE_SUPPORTED:
        try:
            out = _run(True)
        except (TypeError, NotImplementedError, pltpu.LoweringException):
            # Narrow fallback: only a rejected pipeline_mode / Buffered(1) hint
            # lands here; genuine kernel errors re-raise unchanged from the retry.
            out = _run(False)
    else:
        out = _run(False)

    pos = out[:B, :n_pos].astype(jnp.float32).reshape(*orig_lead, n_pos)
    rot = out[:B, n_pos:n_pos + 4].astype(jnp.float32).reshape(*orig_lead, 4)
    return pos, rot


def jigsaw_multi_head_reference(x, params):
    """Pure-JAX f32 reference (mirrors the PyTorch forward in eval mode). Raw params."""
    x32 = x.astype(jnp.float32)
    mu = jnp.mean(x32, axis=-1, keepdims=True)
    var = jnp.mean((x32 - mu) ** 2, axis=-1, keepdims=True)
    xn = (x32 - mu) * jax.lax.rsqrt(var + _LN_EPS) * params["ln_g"] + params["ln_b"]
    h = jax.nn.gelu(xn @ params["w1"].astype(jnp.float32) + params["b1"],
                    approximate=False)
    z = jax.nn.gelu(h @ params["w2"].astype(jnp.float32) + params["b2"],
                    approximate=False)
    pos = z @ params["w_pos"].astype(jnp.float32) + params["b_pos"]
    rot = z @ params["w_rot"].astype(jnp.float32) + params["b_rot"]
    return pos, rot


def jigsaw_multi_head(x, params, **kwargs):
    """Shape-based dispatch: toy problems aren't worth a kernel launch (raw params)."""
    lead = 1
    for s in x.shape[:-1]:
        lead *= s
    if lead < 64 or x.shape[-1] < 128:
        return jigsaw_multi_head_reference(x, params)
    return jigsaw_multi_head_pallas(x, params, **kwargs)


def init_params(key, embed_dim, n_jigsaw_patches, hidden_dim=None):
    """PyTorch-like init. Weights stored [in, out] in bf16; biases/LN params f32."""
    h = hidden_dim or embed_dim
    n_pos = n_jigsaw_patches ** 2
    ks = jax.random.split(key, 10)

    def linear(kw, kb, fan_in, fan_out):
        bound = 1.0 / (fan_in ** 0.5)
        w = jax.random.uniform(kw, (fan_in, fan_out), jnp.float32, -bound, bound)
        b = jax.random.uniform(kb, (fan_out,), jnp.float32, -bound, bound)
        return w.astype(jnp.bfloat16), b

    w1, b1 = linear(ks[0], ks[1], embed_dim, h)
    w2, b2 = linear(ks[2], ks[3], h, embed_dim)
    w_pos, b_pos = linear(ks[4], ks[5], embed_dim, n_pos)
    w_rot, b_rot = linear(ks[6], ks[7], embed_dim, 4)
    ln_g = 1.0 + 0.05 * jax.random.normal(ks[8], (embed_dim,), jnp.float32)
    ln_b = 0.02 * jax.random.normal(ks[9], (embed_dim,), jnp.float32)
    return {"ln_g": ln_g, "ln_b": ln_b, "w1": w1, "b1": b1, "w2": w2, "b2": b2,
            "w_pos": w_pos, "b_pos": b_pos, "w_rot": w_rot, "b_rot": b_rot}


if __name__ == "__main__":
    key = jax.random.PRNGKey(0)
    kx, kp, kp2 = jax.random.split(key, 3)

    batch, embed_dim, n_jigsaw_patches = 128, 128, 3
    x = jax.random.normal(kx, (batch, embed_dim), dtype=jnp.float32)

    # Path 1: fully-resident weights (H == D), small batch tile -> grid (4, 1),
    # default elementwise dtype (bf16 on v6e/v7x) + bf16 output store.
    params = init_params(kp, embed_dim, n_jigsaw_patches)
    prep = prepare_params(params)   # pack/fold once, reuse across forwards
    pos, rot = jigsaw_multi_head_pallas(x, prep, tb=32)
    pos, rot = jax.block_until_ready((pos, rot))
    ref_pos, ref_rot = jigsaw_multi_head_reference(x, params)
    assert pos.shape == (batch, n_jigsaw_patches ** 2)
    assert rot.shape == (batch, 4)
    # bf16 matmuls + (on v6e/v7x) bf16 GELU/approx-recip + bf16 store vs f32 ref.
    assert jnp.allclose(pos, ref_pos, atol=6e-2, rtol=6e-2), "pos mismatch"
    assert jnp.allclose(rot, ref_rot, atol=6e-2, rtol=6e-2), "rot mismatch"

    # Path 2: H-chunked accumulation (hidden=256 split into two 128-wide chunks,
    # the large-D/v7x VMEM path), with f32 elementwise math -> tighter tolerance.
    params2 = init_params(kp2, embed_dim, n_jigsaw_patches, hidden_dim=256)
    pos2, rot2 = jigsaw_multi_head_pallas(x, params2, tb=64, h_chunk=128,
                                          elementwise_dtype=jnp.float32)
    pos2, rot2 = jax.block_until_ready((pos2, rot2))
    ref_pos2, ref_rot2 = jigsaw_multi_head_reference(x, params2)
    assert jnp.allclose(pos2, ref_pos2, atol=4e-2, rtol=4e-2), "pos (chunked) mismatch"
    assert jnp.allclose(rot2, ref_rot2, atol=4e-2, rtol=4e-2), "rot (chunked) mismatch"

    print("KERNEL_OK")
</pallas_src>

<mosaic_0001>
module attributes {stable_mosaic.version = 11 : i64} {
  func.func @kernel(%arg0: i32, %arg1: i32, %arg2: memref<32x128xf32, #tpu.memory_space<vmem>>, %arg3: memref<128x128xbf16, #tpu.memory_space<vmem>>, %arg4: memref<1x128xf32, #tpu.memory_space<vmem>>, %arg5: memref<128x128xbf16, #tpu.memory_space<vmem>>, %arg6: memref<1x128xf32, #tpu.memory_space<vmem>>, %arg7: memref<128x128xbf16, #tpu.memory_space<vmem>>, %arg8: memref<1x128xf32, #tpu.memory_space<vmem>>, %arg9: memref<32x128xbf16, #tpu.memory_space<vmem>>, %arg10: memref<32x128xbf16, #tpu.memory_space<vmem>>, %arg11: memref<32x128xf32, #tpu.memory_space<vmem>>) attributes {dimension_semantics = [#tpu.dimension_semantics<parallel>, #tpu.dimension_semantics<arbitrary>], iteration_bounds = array<i64: 4, 1>, scalar_prefetch = 0 : i64, scratch_operands = 2 : i64, tpu.core_type = #tpu.core_type<tc>, window_params = [{transform_indices = @transform_0, window_bounds = array<i64: 32, 128>}, {pipeline_mode = #tpu.pipeline_mode<synchronous>, transform_indices = @transform_1, window_bounds = array<i64: 128, 128>}, {pipeline_mode = #tpu.pipeline_mode<synchronous>, transform_indices = @transform_2, window_bounds = array<i64: 1, 128>}, {pipeline_mode = #tpu.pipeline_mode<synchronous>, transform_indices = @transform_3, window_bounds = array<i64: 128, 128>}, {pipeline_mode = #tpu.pipeline_mode<synchronous>, transform_indices = @transform_4, window_bounds = array<i64: 1, 128>}, {pipeline_mode = #tpu.pipeline_mode<synchronous>, transform_indices = @transform_5, window_bounds = array<i64: 128, 128>}, {pipeline_mode = #tpu.pipeline_mode<synchronous>, transform_indices = @transform_6, window_bounds = array<i64: 1, 128>}, {transform_indices = @transform_7, window_bounds = array<i64: 32, 128>}]} {
    %c0_i32 = arith.constant 0 : i32
    %0 = arith.cmpi eq, %arg1, %c0_i32 : i32
    %1 = arith.extui %0 : i1 to i32
    %c0_i32_0 = arith.constant 0 : i32
    %2 = arith.cmpi ne, %1, %c0_i32_0 : i32
    scf.if %2 {
      %c0_29 = arith.constant 0 : index
      %c0_30 = arith.constant 0 : index
      %57 = vector.load %arg2[%c0_29, %c0_30] : memref<32x128xf32, #tpu.memory_space<vmem>>, vector<32x128xf32>
      %cst_31 = arith.constant dense<0.000000e+00> : vector<32xf32>
      %58 = vector.multi_reduction <add>, %57, %cst_31 [1] : vector<32x128xf32> to vector<32xf32>
      %59 = vector.shape_cast %58 : vector<32xf32> to vector<32x1xf32>
      %cst_32 = arith.constant 1.280000e+02 : f32
      %60 = vector.broadcast %cst_32 : f32 to vector<32x1xf32>
      %61 = arith.divf %59, %60 : vector<32x1xf32>
      %62 = vector.broadcast %61 : vector<32x1xf32> to vector<32x128xf32>
      %63 = arith.subf %57, %62 : vector<32x128xf32>
      %64 = arith.mulf %63, %63 : vector<32x128xf32>
      %cst_33 = arith.constant dense<0.000000e+00> : vector<32xf32>
      %65 = vector.multi_reduction <add>, %64, %cst_33 [1] : vector<32x128xf32> to vector<32xf32>
      %66 = vector.shape_cast %65 : vector<32xf32> to vector<32x1xf32>
      %cst_34 = arith.constant 1.280000e+02 : f32
      %67 = vector.broadcast %cst_34 : f32 to vector<32x1xf32>
      %68 = arith.divf %66, %67 : vector<32x1xf32>
      %cst_35 = arith.constant 9.99999974E-6 : f32
      %69 = vector.broadcast %cst_35 : f32 to vector<32x1xf32>
      %70 = arith.addf %68, %69 : vector<32x1xf32>
      %71 = math.rsqrt %70 : vector<32x1xf32>
      %72 = vector.broadcast %71 : vector<32x1xf32> to vector<32x128xf32>
      %73 = arith.mulf %63, %72 : vector<32x128xf32>
      %74 = arith.truncf %73 : vector<32x128xf32> to vector<32x128xbf16>
      %c0_36 = arith.constant 0 : index
      %c0_37 = arith.constant 0 : index
      %75 = vector.load %arg10[%c0_36, %c0_37] : memref<32x128xbf16, #tpu.memory_space<vmem>>, vector<32x128xbf16>
      tpu.vector_store %arg10[%c0_36, %c0_37], %74 {strides = array<i32>} : memref<32x128xbf16, #tpu.memory_space<vmem>>, vector<32x128xbf16>,
      %cst_38 = arith.constant 0.000000e+00 : f32
      %76 = vector.broadcast %cst_38 : f32 to vector<32x128xf32>
      %c0_39 = arith.constant 0 : index
      %c0_40 = arith.constant 0 : index
      %77 = vector.load %arg11[%c0_39, %c0_40] : memref<32x128xf32, #tpu.memory_space<vmem>>, vector<32x128xf32>
      tpu.vector_store %arg11[%c0_39, %c0_40], %76 {strides = array<i32>} : memref<32x128xf32, #tpu.memory_space<vmem>>, vector<32x128xf32>,
    } else {
    }
    %c0 = arith.constant 0 : index
    %c0_1 = arith.constant 0 : index
    %3 = vector.load %arg10[%c0, %c0_1] : memref<32x128xbf16, #tpu.memory_space<vmem>>, vector<32x128xbf16>
    %c0_2 = arith.constant 0 : index
    %c0_3 = arith.constant 0 : index
    %4 = vector.load %arg3[%c0_2, %c0_3] : memref<128x128xbf16, #tpu.memory_space<vmem>>, vector<128x128xbf16>
    %cst = arith.constant dense<0.000000e+00> : vector<32x128xf32>
    %5 = tpu.matmul %3, %4, %cst {dimension_numbers = #tpu.dot_dimension_numbers<[1], [0], [0], [1], [0, 0, 1, 1], [], []>} : vector<32x128xbf16>, vector<128x128xbf16>, vector<32x128xf32> -> vector<32x128xf32>
    %c0_4 = arith.constant 0 : index
    %c0_5 = arith.constant 0 : index
    %6 = vector.load %arg4[%c0_4, %c0_5] : memref<1x128xf32, #tpu.memory_space<vmem>>, vector<1x128xf32>
    %7 = vector.broadcast %6 : vector<1x128xf32> to vector<32x128xf32>
    %8 = arith.addf %5, %7 : vector<32x128xf32>
    %cst_6 = arith.constant 5.000000e-01 : f32
    %9 = vector.broadcast %cst_6 : f32 to vector<32x128xf32>
    %10 = arith.mulf %9, %8 : vector<32x128xf32>
    %cst_7 = arith.constant 0.707106769 : f32
    %11 = vector.broadcast %cst_7 : f32 to vector<32x128xf32>
    %12 = arith.mulf %8, %11 : vector<32x128xf32>
    %13 = math.absf %12 : vector<32x128xf32>
    %cst_8 = arith.constant 0.327591091 : f32
    %14 = vector.broadcast %cst_8 : f32 to vector<32x128xf32>
    %15 = arith.mulf %14, %13 : vector<32x128xf32>
    %cst_9 = arith.constant 1.000000e+00 : f32
    %16 = vector.broadcast %cst_9 : f32 to vector<32x128xf32>
    %17 = arith.addf %16, %15 : vector<32x128xf32>
    %18 = tpu.reciprocal %17 {approx = true} : vector<32x128xf32> -> vector<32x128xf32>
    %cst_10 = arith.constant 1.06140542 : f32
    %19 = vector.broadcast %cst_10 : f32 to vector<32x128xf32>
    %20 = arith.mulf %19, %18 : vector<32x128xf32>
    %cst_11 = arith.constant -1.45315206 : f32
    %21 = vector.broadcast %cst_11 : f32 to vector<32x128xf32>
    %22 = arith.addf %20, %21 : vector<32x128xf32>
    %23 = arith.mulf %22, %18 : vector<32x128xf32>
    %cst_12 = arith.constant 1.42141378 : f32
    %24 = vector.broadcast %cst_12 : f32 to vector<32x128xf32>
    %25 = arith.addf %23, %24 : vector<32x128xf32>
    %26 = arith.mulf %25, %18 : vector<32x128xf32>
    %cst_13 = arith.constant -0.284496725 : f32
    %27 = vector.broadcast %cst_13 : f32 to vector<32x128xf32>
    %28 = arith.addf %26, %27 : vector<32x128xf32>
    %29 = arith.mulf %28, %18 : vector<32x128xf32>
    %cst_14 = arith.constant 0.254829586 : f32
    %30 = vector.broadcast %cst_14 : f32 to vector<32x128xf32>
    %31 = arith.addf %29, %30 : vector<32x128xf32>
    %32 = arith.mulf %31, %18 : vector<32x128xf32>
    %cst_15 = arith.constant 0.000000e+00 : f32
    %33 = vector.broadcast %cst_15 : f32 to vector<32x128xf32>
    %34 = arith.subf %33, %13 : vector<32x128xf32>
    %35 = arith.mulf %34, %13 : vector<32x128xf32>
    %36 = math.exp %35 : vector<32x128xf32>
    %37 = arith.mulf %32, %36 : vector<32x128xf32>
    %cst_16 = arith.constant 1.000000e+00 : f32
    %38 = vector.broadcast %cst_16 : f32 to vector<32x128xf32>
    %39 = arith.subf %38, %37 : vector<32x128xf32>
    %cst_17 = arith.constant 0.000000e+00 : f32
    %40 = vector.broadcast %cst_17 : f32 to vector<32x128xf32>
    %41 = arith.cmpf olt, %12, %40 : vector<32x128xf32>
    %cst_18 = arith.constant 0.000000e+00 : f32
    %42 = vector.broadcast %cst_18 : f32 to vector<32x128xf32>
    %43 = arith.subf %42, %39 : vector<32x128xf32>
    %44 = arith.select %41, %43, %39 : vector<32x128xi1>, vector<32x128xf32>
    %cst_19 = arith.constant 1.000000e+00 : f32
    %45 = vector.broadcast %cst_19 : f32 to vector<32x128xf32>
    %46 = arith.addf %45, %44 : vector<32x128xf32>
    %47 = arith.mulf %10, %46 : vector<32x128xf32>
    %c0_20 = arith.constant 0 : index
    %c0_21 = arith.constant 0 : index
    %48 = vector.load %arg11[%c0_20, %c0_21] : memref<32x128xf32, #tpu.memory_space<vmem>>, vector<32x128xf32>
    %49 = arith.truncf %47 : vector<32x128xf32> to vector<32x128xbf16>
    %c0_22 = arith.constant 0 : index
    %c0_23 = arith.constant 0 : index
    %50 = vector.load %arg5[%c0_22, %c0_23] : memref<128x128xbf16, #tpu.memory_space<vmem>>, vector<128x128xbf16>
    %cst_24 = arith.constant dense<0.000000e+00> : vector<32x128xf32>
    %51 = tpu.matmul %49, %50, %cst_24 {dimension_numbers = #tpu.dot_dimension_numbers<[1], [0], [0], [1], [0, 0, 1, 1], [], []>} : vector<32x128xbf16>, vector<128x128xbf16>, vector<32x128xf32> -> vector<32x128xf32>
    %52 = arith.addf %48, %51 : vector<32x128xf32>
    %c0_25 = arith.constant 0 : index
    %c0_26 = arith.constant 0 : index
    %53 = vector.load %arg11[%c0_25, %c0_26] : memref<32x128xf32, #tpu.memory_space<vmem>>, vector<32x128xf32>
    tpu.vector_store %arg11[%c0_25, %c0_26], %52 {strides = array<i32>} : memref<32x128xf32, #tpu.memory_space<vmem>>, vector<32x128xf32>,
    %c0_i32_27 = arith.constant 0 : i32
    %54 = arith.cmpi eq, %arg1, %c0_i32_27 : i32
    %55 = arith.extui %54 : i1 to i32
    %c0_i32_28 = arith.constant 0 : i32
    %56 = arith.cmpi ne, %55, %c0_i32_28 : i32
    scf.if %56 {
      %c0_29 = arith.constant 0 : index
      %c0_30 = arith.constant 0 : index
      %57 = vector.load %arg11[%c0_29, %c0_30] : memref<32x128xf32, #tpu.memory_space<vmem>>, vector<32x128xf32>
      %c0_31 = arith.constant 0 : index
      %c0_32 = arith.constant 0 : index
      %58 = vector.load %arg6[%c0_31, %c0_32] : memref<1x128xf32, #tpu.memory_space<vmem>>, vector<1x128xf32>
      %59 = vector.broadcast %58 : vector<1x128xf32> to vector<32x128xf32>
      %60 = arith.addf %57, %59 : vector<32x128xf32>
      %cst_33 = arith.constant 5.000000e-01 : f32
      %61 = vector.broadcast %cst_33 : f32 to vector<32x128xf32>
      %62 = arith.mulf %61, %60 : vector<32x128xf32>
      %cst_34 = arith.constant 0.707106769 : f32
      %63 = vector.broadcast %cst_34 : f32 to vector<32x128xf32>
      %64 = arith.mulf %60, %63 : vector<32x128xf32>
      %65 = math.absf %64 : vector<32x128xf32>
      %cst_35 = arith.constant 0.327591091 : f32
      %66 = vector.broadcast %cst_35 : f32 to vector<32x128xf32>
      %67 = arith.mulf %66, %65 : vector<32x128xf32>
      %cst_36 = arith.constant 1.000000e+00 : f32
      %68 = vector.broadcast %cst_36 : f32 to vector<32x128xf32>
      %69 = arith.addf %68, %67 : vector<32x128xf32>
      %70 = tpu.reciprocal %69 {approx = true} : vector<32x128xf32> -> vector<32x128xf32>
      %cst_37 = arith.constant 1.06140542 : f32
      %71 = vector.broadcast %cst_37 : f32 to vector<32x128xf32>
      %72 = arith.mulf %71, %70 : vector<32x128xf32>
      %cst_38 = arith.constant -1.45315206 : f32
      %73 = vector.broadcast %cst_38 : f32 to vector<32x128xf32>
      %74 = arith.addf %72, %73 : vector<32x128xf32>
      %75 = arith.mulf %74, %70 : vector<32x128xf32>
      %cst_39 = arith.constant 1.42141378 : f32
      %76 = vector.broadcast %cst_39 : f32 to vector<32x128xf32>
      %77 = arith.addf %75, %76 : vector<32x128xf32>
      %78 = arith.mulf %77, %70 : vector<32x128xf32>
      %cst_40 = arith.constant -0.284496725 : f32
      %79 = vector.broadcast %cst_40 : f32 to vector<32x128xf32>
      %80 = arith.addf %78, %79 : vector<32x128xf32>
      %81 = arith.mulf %80, %70 : vector<32x128xf32>
      %cst_41 = arith.constant 0.254829586 : f32
      %82 = vector.broadcast %cst_41 : f32 to vector<32x128xf32>
      %83 = arith.addf %81, %82 : vector<32x128xf32>
      %84 = arith.mulf %83, %70 : vector<32x128xf32>
      %cst_42 = arith.constant 0.000000e+00 : f32
      %85 = vector.broadcast %cst_42 : f32 to vector<32x128xf32>
      %86 = arith.subf %85, %65 : vector<32x128xf32>
      %87 = arith.mulf %86, %65 : vector<32x128xf32>
      %88 = math.exp %87 : vector<32x128xf32>
      %89 = arith.mulf %84, %88 : vector<32x128xf32>
      %cst_43 = arith.constant 1.000000e+00 : f32
      %90 = vector.broadcast %cst_43 : f32 to vector<32x128xf32>
      %91 = arith.subf %90, %89 : vector<32x128xf32>
      %cst_44 = arith.constant 0.000000e+00 : f32
      %92 = vector.broadcast %cst_44 : f32 to vector<32x128xf32>
      %93 = arith.cmpf olt, %64, %92 : vector<32x128xf32>
      %cst_45 = arith.constant 0.000000e+00 : f32
      %94 = vector.broadcast %cst_45 : f32 to vector<32x128xf32>
      %95 = arith.subf %94, %91 : vector<32x128xf32>
      %96 = arith.select %93, %95, %91 : vector<32x128xi1>, vector<32x128xf32>
      %cst_46 = arith.constant 1.000000e+00 : f32
      %97 = vector.broadcast %cst_46 : f32 to vector<32x128xf32>
      %98 = arith.addf %97, %96 : vector<32x128xf32>
      %99 = arith.mulf %62, %98 : vector<32x128xf32>
      %100 = arith.truncf %99 : vector<32x128xf32> to vector<32x128xbf16>
      %c0_47 = arith.constant 0 : index
      %c0_48 = arith.constant 0 : index
      %101 = vector.load %arg7[%c0_47, %c0_48] : memref<128x128xbf16, #tpu.memory_space<vmem>>, vector<128x128xbf16>
      %cst_49 = arith.constant dense<0.000000e+00> : vector<32x128xf32>
      %102 = tpu.matmul %100, %101, %cst_49 {dimension_numbers = #tpu.dot_dimension_numbers<[1], [0], [0], [1], [0, 0, 1, 1], [], []>} : vector<32x128xbf16>, vector<128x128xbf16>, vector<32x128xf32> -> vector<32x128xf32>
      %c0_50 = arith.constant 0 : index
      %c0_51 = arith.constant 0 : index
      %103 = vector.load %arg8[%c0_50, %c0_51] : memref<1x128xf32, #tpu.memory_space<vmem>>, vector<1x128xf32>
      %104 = vector.broadcast %103 : vector<1x128xf32> to vector<32x128xf32>
      %105 = arith.addf %102, %104 : vector<32x128xf32>
      %106 = arith.truncf %105 : vector<32x128xf32> to vector<32x128xbf16>
      %c0_52 = arith.constant 0 : index
      %c0_53 = arith.constant 0 : index
      %107 = vector.load %arg9[%c0_52, %c0_53] : memref<32x128xbf16, #tpu.memory_space<vmem>>, vector<32x128xbf16>
      tpu.vector_store %arg9[%c0_52, %c0_53], %106 {strides = array<i32>} : memref<32x128xbf16, #tpu.memory_space<vmem>>, vector<32x128xbf16>,
    } else {
    }
    return
  }
  func.func @transform_0(%arg0: i32, %arg1: i32) -> (i32, i32) {
    %c0_i32 = arith.constant 0 : i32
    %c0_i32_0 = arith.constant 0 : i32
    return %arg0, %c0_i32 : i32, i32
  }
  func.func @transform_1(%arg0: i32, %arg1: i32) -> (i32, i32) {
    %c0_i32 = arith.constant 0 : i32
    %c0_i32_0 = arith.constant 0 : i32
    %c0_i32_1 = arith.constant 0 : i32
    return %c0_i32, %c0_i32_0 : i32, i32
  }
  func.func @transform_2(%arg0: i32, %arg1: i32) -> (i32, i32) {
    %c0_i32 = arith.constant 0 : i32
    %c0_i32_0 = arith.constant 0 : i32
    %c0_i32_1 = arith.constant 0 : i32
    return %c0_i32, %c0_i32_0 : i32, i32
  }
  func.func @transform_3(%arg0: i32, %arg1: i32) -> (i32, i32) {
    %c0_i32 = arith.constant 0 : i32
    %c0_i32_0 = arith.constant 0 : i32
    %c0_i32_1 = arith.constant 0 : i32
    return %c0_i32, %c0_i32_0 : i32, i32
  }
  func.func @transform_4(%arg0: i32, %arg1: i32) -> (i32, i32) {
    %c0_i32 = arith.constant 0 : i32
    %c0_i32_0 = arith.constant 0 : i32
    %c0_i32_1 = arith.constant 0 : i32
    return %c0_i32, %c0_i32_0 : i32, i32
  }
  func.func @transform_5(%arg0: i32, %arg1: i32) -> (i32, i32) {
    %c0_i32 = arith.constant 0 : i32
    %c0_i32_0 = arith.constant 0 : i32
    %c0_i32_1 = arith.constant 0 : i32
    return %c0_i32, %c0_i32_0 : i32, i32
  }
  func.func @transform_6(%arg0: i32, %arg1: i32) -> (i32, i32) {
    %c0_i32 = arith.constant 0 : i32
    %c0_i32_0 = arith.constant 0 : i32
    %c0_i32_1 = arith.constant 0 : i32
    return %c0_i32, %c0_i32_0 : i32, i32
  }
  func.func @transform_7(%arg0: i32, %arg1: i32) -> (i32, i32) {
    %c0_i32 = arith.constant 0 : i32
    %c0_i32_0 = arith.constant 0 : i32
    return %arg0, %c0_i32 : i32, i32
  }
}

</mosaic_0001>

<bundles_post_ra>
// kernel: tpu_custom_call.1
= control target key start
LH: loop header
LB: loop body
LE: loop exit
PB: predicated region body
PF: predicated region fallthrough
CT: control target
= control target key end

     0   :  { %s2098_s0 = inlined_call_operand.hbm [shape: f32[128,128], index: 0, kind: input, shape index: {}]   ;;  %s2099_s1 = inlined_call_operand.hbm [shape: bf16[128,128], index: 1, kind: input, shape index: {}]   ;;  %s2100_s2 = inlined_call_operand.vmem [shape: f32[1,128], index: 2, kind: input, shape index: {}]   ;;  %s2101_s3 = inlined_call_operand.hbm [shape: bf16[128,128], index: 3, kind: input, shape index: {}]   ;;  %s2102_s4 = inlined_call_operand.vmem [shape: f32[1,128], index: 4, kind: input, shape index: {}]   ;;  %s2103_s5 = inlined_call_operand.hbm [shape: bf16[128,128], index: 5, kind: input, shape index: {}]   ;;  %s2104_s6 = inlined_call_operand.vmem [shape: f32[1,128], index: 6, kind: input, shape index: {}]   ;;  %s2105_s7 = inlined_call_operand.hbm [shape: bf16[128,128], index: 7, kind: output, shape index: {}]  }
   0x1   :  { %2113 = sst [smem:[#allocation19_spill]] %s2104_s6 }
   0x2   :  { %2114 = sst [smem:[#allocation20_spill]] %s2105_s7 }
   0x3   :  { %12 = vsyncpa [#allocation5], 0 }
   0x4   :  { %14 = vsyncpa [#allocation5 + $0x1], 0 }
   0x5   :  { %15 = vsyncpa [#allocation8], 0 }
   0x6   :  { %16 = vsyncpa [#allocation11], 0 }
   0x7   :  { %17 = vsyncpa [#allocation6], 0 }
   0x8   :  { %19 = vsyncpa [#allocation6 + $0x1], 0  ;;  %s1737_s24 = smov 0   ;;  %s1739_s25 = smov 0  }
   0x9   :  { %s1741_s26 = smov 0   ;;  %s1743_s27 = smov 0  }
   0xa   :  { %s1745_s28 = smov 0   ;;  %s1747_s29 = smov 0  }
   0xb LB: > { %2115 = sst [smem:[#allocation17_spill]] %s1664_s24  ;;  %s1158_s30 = sadd.s32 4294967295, %s1684_s29   ;;  %s1684_s29 = sphi %s1747_s29, %s25_s29   ;;  %s1680_s28 = sphi %s1745_s28, %s2139_s28   ;;  %s1676_s27 = sphi %s1743_s27, %s2138_s27   ;;  %s1672_s26 = sphi %s1741_s26, %s2137_s26   ;;  %s1668_s25 = sphi %s1739_s25, %s2136_s25   ;;  %s1664_s24 = sphi %s1737_s24, %s2135_s24  }
   0xc   : > { %s1159_s8 = sadd.s32 4294967294, %s1684_s29   ;;  %p57_p0 = scmp.ne.s32.totalorder %s1668_s25, %s1664_s24 }
   0xd   : > { %p1771_p1 = scmp.eq.s32.totalorder %s1158_s30, 0  ;;  %p1775_p2 = scmp.eq.s32.totalorder %s1158_s30, 3 }
   0xe   : > { %p213_p3 = scmp.eq.s32.totalorder %s1159_s8, 3  ;;  %p1160_p5 = scmp.ge.s32.totalorder %s1684_s29, 1 }
   0xf   : > { %s2116_s9 = scalar_select %p1771_p1, 1, 0 }
  0x10   : > { %s2117_s10 = scalar_select %p1775_p2, 1, 0 }
  0x11   : > { %p1781_p4 = por %p1771_p1, %p57_p0  ;;  %p1786_p6 = por %p213_p3, %p57_p0 }
  0x12   : > { %p220_p7 = scmp.lt.s32.totalorder %s1684_s29, 5  ;;  %s1686_s14 = smov [#allocation7]  }
  0x13   : > { %s2118_s11 = scalar_select %p1781_p4, 1, 0 }
  0x14   : > { %s2119_s12 = scalar_select %p1786_p6, 1, 0 }
  0x15   : > { %p1791_p8 = pnand %p1160_p5, %p220_p7  ;;  %s232_s15 = sshll.u32 %s1686_s14, 4  ;;  %s1795_s15 = int_to_ptr.vmem [resolvable:$true] %s232_s15 }
  0x16   : > { %2120 = sst [smem:[#allocation18_spill]] %s2119_s12  ;;  %s1687_s17 = smov [#allocation9]  }
  0x17   : > { %s2121_s13 = scalar_select %p1791_p8, 1, 0 }
  0x18   : > { %p1333_p9 = pneg %p1791_p8  ;;  %s248_s18 = sshll.u32 %s1687_s17, 4  ;;  %s1805_s18 = int_to_ptr.vmem [resolvable:$true] %s248_s18 }
  0x19   : > { %s1688_s19 = smov [#allocation10]   ;;  %s1480_s23 = scalar_lea.hbm %s2099_s1, 1024 }
  0x1a   : > { %p1801_p10 = pnand %p1333_p9, %p1771_p1  ;;  %s1807_s20 = sshll.u32 %s1688_s19, 4  ;;  %s265_s20 = int_to_ptr.vmem [resolvable:$true] %s1807_s20 }
  0x1b   : > { %p1481_p11 = scmp.ne.s32.totalorder %s2099_s1, %s1480_s23  ;;  %p1487_p3 = scmp.lt.u32.totalorder %s1480_s23, %s2099_s1 }
  0x1c   : > { %p1817_p12 = pneg %p1801_p10 }
  0x1e   : > { %p1483_p13 = pnand %p1817_p12, %p1481_p11 }
  0x20   : > { %p1484_p0 = pneg %p1483_p13 }
  0x22   : > { %p1489_p5 = pnand %p1487_p3, %p1484_p0 }
  0x24   : > { %1492 = shalt.err (!%p1489_p5)
}
  0x25   : > { %s1493_s21 = scalar_lea.vmem %s1795_s15, 1024  ;;  %p1501_p1 = scmp.lt.s32.totalorder %s1795_s15, %s1795_s15 }
  0x26   : > { %p1494_p7 = scmp.ne.s32.totalorder %s1795_s15, %s1493_s21  ;;  %p1502_p4 = scmp.lt.s32.totalorder %s1493_s21, %s1493_s21 }
  0x28   : > { %p1496_p9 = pnand %p1494_p7, %p1817_p12  ;;  %p1503_p11 = por %p1502_p4, %p1501_p1 }
  0x2a   : > { %p1497_p6 = pneg %p1496_p9 }
  0x2c   : > { %p1504_p13 = pnand %p1503_p11, %p1497_p6 }
  0x2e   : > { %1507 = shalt.err (!%p1504_p13)
}
  0x2f   : > { %s1689_s22 = smov 64   ;;  %s1690_s23 = smov 4  }
  0x30   : > { %1336 = dma.hbm_to_vmem [thread:$0]  (!%p1801_p10), %s2099_s1, 1024, %s1795_s15, [#allocation8], %s1689_s22, %s1689_s22, %s1690_s23  }
  0x31   : > { %s1508_s21 = scalar_lea.hbm %s2101_s3, 1024 }
  0x32   : > { %p1509_p1 = scmp.ne.s32.totalorder %s2101_s3, %s1508_s21  ;;  %p1515_p0 = scmp.lt.u32.totalorder %s1508_s21, %s2101_s3 }
  0x34   : > { %p1511_p4 = pnand %p1509_p1, %p1817_p12 }
  0x36   : > { %p1512_p6 = pneg %p1511_p4 }
  0x38   : > { %p1517_p3 = pnand %p1515_p0, %p1512_p6 }
  0x3a   : > { %1520 = shalt.err (!%p1517_p3)
}
  0x3b   : > { %s1521_s15 = scalar_lea.vmem %s1805_s18, 1024  ;;  %p1529_p11 = scmp.lt.s32.totalorder %s1805_s18, %s1805_s18 }
  0x3c   : > { %p1522_p5 = scmp.ne.s32.totalorder %s1805_s18, %s1521_s15  ;;  %p1530_p13 = scmp.lt.s32.totalorder %s1521_s15, %s1521_s15 }
  0x3e   : > { %p1524_p7 = pnand %p1522_p5, %p1817_p12  ;;  %p1531_p1 = por %p1530_p13, %p1529_p11 }
  0x40   : > { %p1525_p9 = pneg %p1524_p7 }
  0x42   : > { %p1532_p4 = pnand %p1531_p1, %p1525_p9 }
  0x44   : > { %1535 = shalt.err (!%p1532_p4)
}
  0x45   : > { %1339 = dma.hbm_to_vmem [thread:$0]  (!%p1801_p10), %s2101_s3, 1024, %s1805_s18, [#allocation8], %s1689_s22, %s1689_s22, %s1690_s23  }
  0x46   : > { %s1536_s30 = scalar_lea.hbm %s2103_s5, 1024 }
  0x47   : > { %p1537_p6 = scmp.ne.s32.totalorder %s2103_s5, %s1536_s30  ;;  %p1543_p5 = scmp.lt.u32.totalorder %s1536_s30, %s2103_s5 }
  0x49   : > { %p1539_p0 = pnand %p1537_p6, %p1817_p12 }
  0x4b   : > { %p1540_p3 = pneg %p1539_p0 }
  0x4d   : > { %p1545_p7 = pnand %p1543_p5, %p1540_p3 }
  0x4f   : > { %1548 = shalt.err (!%p1545_p7)
}
  0x50   : > { %s1549_s15 = scalar_lea.vmem %s265_s20, 1024  ;;  %p1557_p1 = scmp.lt.s32.totalorder %s265_s20, %s265_s20 }
  0x51   : > { %p1550_p9 = scmp.ne.s32.totalorder %s265_s20, %s1549_s15  ;;  %p1558_p4 = scmp.lt.s32.totalorder %s1549_s15, %s1549_s15 }
  0x53   : > { %p1552_p11 = pnand %p1550_p9, %p1817_p12  ;;  %p1559_p8 = por %p1558_p4, %p1557_p1 }
  0x55   : > { %p1553_p13 = pneg %p1552_p11 }
  0x57   : > { %p1560_p2 = pnand %p1559_p8, %p1553_p13 }
  0x59   : > { %1563 = shalt.err (!%p1560_p2)
}
  0x5a   : > { %1342 = dma.hbm_to_vmem [thread:$0]  (!%p1801_p10), %s2103_s5, 1024, %s265_s20, [#allocation11], %s1689_s22, %s1689_s22, %s1690_s23  }
  0x5b   : > { %s44_s14 = sadd.s32 1, %s1672_s26  ;;  %s37_s16 = sadd.s32 1, %s1680_s28 }
  0x5c   : > { %p51_p2 = scmp.ne.s32.totalorder %s1672_s26, %s1668_s25  ;;  %p39_p8 = scmp.ge.s32.totalorder %s37_s16, 4 }
  0x5d   : > { %p52_p12 = scmp.eq.s32.totalorder %s1684_s29, 0  ;;  %p2124_p6 = scmp.ne.s32.totalorder %s2117_s10, 0 }
  0x5e   : > { %p1354_p3 = scmp.lt.s32.totalorder %s1684_s29, 4  ;;  %s2141_s16 = smov (%p39_p8, %s37_s16), 0 }
  0x5f   : > { %p1896_p0 = por %p2124_p6, %p51_p2  ;;  %p53_p5 = por %p52_p12, %p51_p2 }
  0x60   : > { %s281_s24 = sand.u32 1, %s1672_s26   ;;  %s41_s12 = ssub.s32 %s1680_s28, %s2141_s16 }
  0x61   : > { %p42_p7 = scmp.eq.s32.totalorder %s41_s12, 0  ;;  %s1165_s20 = sshll.u32 %s281_s24, 5 }
  0x62   : > { %s1210_s22 = sshll.u32 %s1680_s28, 9  ;;  %s285_s17 = scalar_lea.vmem [#allocation4], %s1165_s20 }
  0x63   : > { %s1908_s23 = scalar_select %p42_p7, %s1672_s26, %s44_s14  }
  0x64   : > { %s1913_s10 = scalar_lea.hbm %s2098_s0, %s1210_s22  ;;  %s292_s19 = sshll.u32 %s285_s17, 4  ;;  %s1915_s19 = int_to_ptr.vmem [resolvable:$true] %s292_s19 }
  0x65   : > { %p1919_p10 = pnand %p1354_p3, %p53_p5  ;;  %s1923_s15 = scalar_lea.sflag [#allocation5], %s281_s24 }
  0x66   : > { %s1564_s18 = scalar_lea.hbm %s1913_s10, 512  ;;  %s1569_s12 = scalar_lea.hbm %s2098_s0, 2048 }
  0x67   : > { %p1565_p9 = scmp.ne.s32.totalorder %s1913_s10, %s1564_s18  ;;  %p1566_p11 = pneg %p1919_p10 }
  0x68   : > { %p1570_p4 = scmp.lt.u32.totalorder %s1913_s10, %s2098_s0  ;;  %p1571_p2 = scmp.lt.u32.totalorder %s1569_s12, %s1564_s18 }
  0x69   : > { %p1567_p13 = pnand %p1566_p11, %p1565_p9  ;;  %p1573_p12 = scmp.lt.u32.totalorder %s1564_s18, %s1913_s10 }
  0x6a   : > { %p1572_p8 = por %p1571_p2, %p1570_p4 }
  0x6b   : > { %p1568_p1 = pneg %p1567_p13 }
  0x6c   : > { %p1574_p6 = por %p1573_p12, %p1572_p8 }
  0x6e   : > { %p1575_p3 = pnand %p1574_p6, %p1568_p1 }
  0x70   : > { %1578 = shalt.err (!%p1575_p3)
}
  0x71   : > { %s1579_s24 = scalar_lea.vmem %s1915_s19, 512  ;;  %s1691_s30 = smov [#allocation4]  }
  0x72   : > { %p1580_p5 = scmp.ne.s32.totalorder %s1915_s19, %s1579_s24  ;;  %s1584_s8 = sshll.u32 %s1691_s30, 4  ;;  %s1585_s8 = int_to_ptr.vmem [resolvable:$false] %s1584_s8 }
  0x73   : > { %s1586_s17 = scalar_lea.vmem %s1585_s8, 1024  ;;  %p1587_p13 = scmp.lt.s32.totalorder %s1915_s19, %s1585_s8 }
  0x74   : > { %p1582_p7 = pnand %p1580_p5, %p1566_p11  ;;  %p1588_p4 = scmp.lt.s32.totalorder %s1586_s17, %s1579_s24 }
  0x76   : > { %p1583_p9 = pneg %p1582_p7  ;;  %p1589_p2 = por %p1588_p4, %p1587_p13 }
  0x78   : > { %p1590_p8 = pnand %p1589_p2, %p1583_p9 }
  0x7a   : > { %1593 = shalt.err (!%p1590_p8)
}
  0x7b   : > { %s1692_s18 = smov 128   ;;  %s1693_s6 = smov 8  }
  0x7c   : > { %1346 = dma.hbm_to_vmem [thread:$0]  (!%p1919_p10), %s1913_s10, 512, %s1915_s19, %s1923_s15, %s1692_s18, %s1692_s18, %s1693_s6  }
  0x7d   : > { %p2127_p11 = scmp.ne.s32.totalorder %s2121_s13, 0 }
  0x7e   : > { %s1954_s14 = sand.u32 (!%p2127_p11), 1, %s1668_s25   ;;  %p2128_p1 = scmp.ne.s32.totalorder (!%p2127_p11), %s2118_s11, 0 }
  0x7f   : > { %304 = sbr.rel (%p2127_p11) target bundleno = 1228 (0x4cc), region = 48  ;;  %s1169_s12 = sshll.u32 (!%p2127_p11), %s1954_s14, 5 }
  0x80   : > { %s307_s20 = scalar_lea.sflag (!%p2127_p11), [#allocation5], %s1954_s14  ;;  %s310_s22 = scalar_lea.vmem (!%p2127_p11), [#allocation4], %s1169_s12 }
  0x86   : > { %1647 = dma.done.wait (%p2128_p1), %s307_s20, 512  }
  0x87   : > { %1649 = vsyncadd (%p2128_p1), %s307_s20, 4294966784  ;;  %p2129_p12 = scmp.ne.s32.totalorder %s2116_s9, 0 }
  0x89   : > { %1651 = dma.done.wait (%p2129_p12), [#allocation8], 2048  }
  0x8a   : > { %1653 = vsyncadd (%p2129_p12), [#allocation8], 4294965248 }
  0x8b   : > { %1655 = dma.done.wait (%p2129_p12), [#allocation11], 1024  }
  0x8c   : > { %1657 = vsyncadd (%p2129_p12), [#allocation11], 4294966272  ;;  %v360_v0 = vld [vmem:[%s310_s22] sm:$0xff]  ;;  %v362_v1 = vld [vmem:[%s310_s22 + $0x10] sm:$0xff]  ;;  %s1173_s19 = sshll.u32 %s1954_s14, 4  ;;  %s2130_s24 = sld [smem:[#allocation19_spill]] }
  0x8d   : > { %v361_v2 = vld [vmem:[%s310_s22 + $0x8] sm:$0xff]  ;;  %364 = vadd.xlane.f32.xlu0 %v360_v0  ;;  %368 = vadd.xlane.f32.xlu1 %v362_v1  ;;  %v363_v3 = vld [vmem:[%s310_s22 + $0x18] sm:$0xff]  ;;  %v1416_v4 = vld [vmem:[#allocation7] sm:$0xff]   ;;  %s352_s30 = scalar_lea.vmem [#allocation12], %s1173_s19  ;;  %s1215_s17 = sshll.u32 %s1676_s27, 8 }
  0x8e   : > { %v1417_v5 = vld [vmem:[#allocation7 + $0x8] sm:$0xff]   ;;  %1257 = vmatprep.subr.bf16.mxu0 %v1416_v4  ;;  %v1418_v22 = vld [vmem:[#allocation7 + $0x10] sm:$0xff]   ;;  %v1419_v23 = vld [vmem:[#allocation7 + $0x18] sm:$0xff]   ;;  %s1048_s8 = sshll.u32 %s352_s30, 4  ;;  %s2131_s12 = sld [smem:[#allocation20_spill]]  ;;  %s2045_s8 = int_to_ptr.vmem [resolvable:$true] %s1048_s8 }
  0x8f   : > { %1258 = vmatpush3.bf16.msra.mxu0 %v1416_v4  ;;  %v1420_v24 = vld [vmem:[#allocation7 + $0x20] sm:$0xff]   ;;  %v1421_v25 = vld [vmem:[#allocation7 + $0x28] sm:$0xff]   ;;  %v1422_v26 = vld [vmem:[#allocation7 + $0x30] sm:$0xff]   ;;  %s1035_s27 = scalar_lea.sflag [#allocation6], %s1954_s14  ;;  %s1594_s22 = scalar_lea.vmem %s2045_s8, 256 }
  0x90   : > { %1259 = vmatprep.subr.bf16.mxu0 %v1417_v5  ;;  %v1423_v27 = vld [vmem:[#allocation7 + $0x38] sm:$0xff]   ;;  %v1424_v50 = vld [vmem:[#allocation9] sm:$0xff]   ;;  %v1425_v51 = vld [vmem:[#allocation9 + $0x8] sm:$0xff]   ;;  %p1595_p10 = scmp.ne.s32.totalorder %s2045_s8, %s1594_s22  ;;  %s1694_s9 = smov [#allocation12]  }
  0x91   : > { %366 = vadd.xlane.f32.xlu0 %v361_v2  ;;  %370 = vadd.xlane.f32.xlu1 %v363_v3  ;;  %v1426_v52 = vld [vmem:[#allocation9 + $0x10] sm:$0xff]   ;;  %v1427_v53 = vld [vmem:[#allocation9 + $0x18] sm:$0xff]   ;;  %v1428_v54 = vld [vmem:[#allocation9 + $0x20] sm:$0xff]   ;;  %s1598_s11 = sshll.u32 %s1694_s9, 4  ;;  %s1599_s11 = int_to_ptr.vmem [resolvable:$false] %s1598_s11 }
  0x92   : > { %1277 = vmatprep.subr.bf16.mxu1 %v1424_v50  ;;  %v1429_v55 = vld [vmem:[#allocation9 + $0x28] sm:$0xff]   ;;  %v1430_v56 = vld [vmem:[#allocation9 + $0x30] sm:$0xff]   ;;  %v1431_v57 = vld [vmem:[#allocation9 + $0x38] sm:$0xff]   ;;  %p1596_p6 = pnand %p1595_p10, %p1896_p0  ;;  %s1600_s13 = scalar_lea.vmem %s1599_s11, 512 }
  0x93   : > { %1260 = vmatpush3.bf16.msra.mxu0 %v1417_v5  ;;  %1278 = vmatpush3.bf16.msra.mxu1 %v1424_v50  ;;  %v1174_v58 = vld [vmem:[%s2100_s2] ss:$0 sm:$0xff]  ;;  %p1601_p5 = scmp.lt.s32.totalorder %s2045_s8, %s1599_s11  ;;  %p1602_p7 = scmp.lt.s32.totalorder %s1600_s13, %s1594_s22 }
  0x94   : > { %1261 = vmatprep.subr.bf16.mxu0 %v1418_v22  ;;  %1279 = vmatprep.subr.bf16.mxu1 %v1425_v51  ;;  %s2050_s20 = scalar_lea.hbm %s2131_s12, %s1215_s17  ;;  %p1597_p3 = pneg %p1596_p6 }
  0x95   : > { %p1603_p9 = por %p1602_p7, %p1601_p5 }
  0x97   : > { %1262 = vmatpush3.bf16.msra.mxu0 %v1418_v22  ;;  %1280 = vmatpush3.bf16.msra.mxu1 %v1425_v51  ;;  %p1604_p13 = pnand %p1603_p9, %p1597_p3 }
  0x98   : > { %1263 = vmatprep.subr.bf16.mxu0 %v1419_v23  ;;  %1281 = vmatprep.subr.bf16.mxu1 %v1426_v52 }
  0x9b   : > { %1264 = vmatpush3.bf16.msra.mxu0 %v1419_v23  ;;  %1282 = vmatpush3.bf16.msra.mxu1 %v1426_v52 }
  0x9c   : > { %1265 = vmatprep.subr.bf16.mxu0 %v1420_v24  ;;  %1283 = vmatprep.subr.bf16.mxu1 %v1427_v53 }
  0x9f   : > { %1266 = vmatpush3.bf16.msra.mxu0 %v1420_v24  ;;  %1284 = vmatpush3.bf16.msra.mxu1 %v1427_v53 }
  0xa0   : > { %1267 = vmatprep.subr.bf16.mxu0 %v1421_v25  ;;  %1285 = vmatprep.subr.bf16.mxu1 %v1428_v54 }
  0xa3   : > { %1268 = vmatpush3.bf16.msra.mxu0 %v1421_v25  ;;  %1286 = vmatpush3.bf16.msra.mxu1 %v1428_v54 }
  0xa4   : > { %1269 = vmatprep.subr.bf16.mxu0 %v1422_v26  ;;  %1287 = vmatprep.subr.bf16.mxu1 %v1429_v55 }
  0xa7   : > { %1270 = vmatpush3.bf16.msra.mxu0 %v1422_v26  ;;  %1288 = vmatpush3.bf16.msra.mxu1 %v1429_v55 }
  0xa8   : > { %1271 = vmatprep.subr.bf16.mxu0 %v1423_v27  ;;  %1289 = vmatprep.subr.bf16.mxu1 %v1430_v56 }
  0xab   : > { %1272 = vmatpush3.bf16.msra.mxu0 %v1423_v27  ;;  %1290 = vmatpush3.bf16.msra.mxu1 %v1430_v56 }
  0xac   : > { %1291 = vmatprep.subr.bf16.mxu1 %v1431_v57 }
  0xaf   : > { %1292 = vmatpush3.bf16.msra.mxu1 %v1431_v57 }
 0x11a   : > { %v365_v6 = vpop.xlane.xlu0 %364  ;;  %v369_v7 = vpop.xlane.xlu1 %368 }
 0x11b   : > { %v373_v8 = vmul.f32 0.0078125, %v365_v6  ;;  %v375_v9 = vmul.f32 0.0078125, %v369_v7 }
 0x11d   : > { %v377_v10 = vsub.f32 %v360_v0, %v373_v8  ;;  %v379_v11 = vsub.f32 %v362_v1, %v375_v9 }
 0x11e   : > { %v367_v12 = vpop.xlane.xlu0 %366  ;;  %v371_v13 = vpop.xlane.xlu1 %370 }
 0x11f   : > { %v374_v14 = vmul.f32 0.0078125, %v367_v12  ;;  %v381_v15 = vmul.f32 %v377_v10, %v377_v10  ;;  %v376_v16 = vmul.f32 0.0078125, %v371_v13  ;;  %v383_v19 = vmul.f32 %v379_v11, %v379_v11 }
 0x121   : > { %v378_v17 = vsub.f32 %v361_v2, %v374_v14  ;;  %385 = vadd.xlane.f32.xlu0 %v381_v15  ;;  %v380_v18 = vsub.f32 %v363_v3, %v376_v16 }
 0x123   : > { %v382_v20 = vmul.f32 %v378_v17, %v378_v17  ;;  %v384_v21 = vmul.f32 %v380_v18, %v380_v18 }
 0x125   : > { %389 = vadd.xlane.f32.xlu0 %v383_v19  ;;  %387 = vadd.xlane.f32.xlu1 %v382_v20 }
 0x129   : > { %391 = vadd.xlane.f32.xlu1 %v384_v21 }
 0x1ae   : > { %v386_v28 = vpop.xlane.xlu0 %385 }
 0x1af   : > { %v393_v29 = vmul.f32 0.0078125, %v386_v28 }
 0x1b1   : > { %v397_v30 = vadd.f32 1e-05, %v393_v29 }
 0x1b2   : > { %v388_v31 = vpop.xlane.xlu1 %387  ;;  %v390_v32 = vpop.xlane.xlu0 %389 }
 0x1b3   : > { %v394_v33 = vmul.f32 0.0078125, %v388_v31  ;;  %v395_v34 = vmul.f32 0.0078125, %v390_v32  ;;  %1440 = vrsqrt.f32 %v397_v30 }
 0x1b5   : > { %v398_v35 = vadd.f32 1e-05, %v394_v33  ;;  %v399_v36 = vadd.f32 1e-05, %v395_v34 }
 0x1b6   : > { %v392_v37 = vpop.xlane.xlu1 %391 }
 0x1b7   : > { %1442 = vrsqrt.f32 %v398_v35  ;;  %v396_v38 = vmul.f32 0.0078125, %v392_v37 }
 0x1b8   : > { %1444 = vrsqrt.f32 %v399_v36 }
 0x1b9   : > { %v400_v39 = vadd.f32 1e-05, %v396_v38 }
 0x1bb   : > { %1446 = vrsqrt.f32 %v400_v39 }
 0x1bd   : > { %v1441_v40 = vpop.eup %1440 }
 0x1be   : > { %v405_v42 = vmul.f32 %v1441_v40, %v377_v10 }
 0x1c1   : > { %v1443_v41 = vpop.eup %1442 }
 0x1c2   : > { %v406_v43 = vmul.f32 %v1443_v41, %v378_v17  ;;  %v1445_v44 = vpop.eup %1444 }
 0x1c3   : > { %v407_v47 = vmul.f32 %v1445_v44, %v379_v11 }
 0x1c4   : > { %v409_v45 = vpack.c.bf16 %v406_v43, %v405_v42 }
 0x1c5   : > { %v1447_v46 = vpop.eup %1446 }
 0x1c6   : > { %1273 = vmatprep.mubr.bf16.mxu0 %v409_v45  ;;  %v408_v48 = vmul.f32 %v1447_v46, %v380_v18 }
 0x1c8   : > { %v410_v49 = vpack.c.bf16 %v408_v48, %v407_v47 }
 0x1ca   : > { %1274 = vmatmul.mubr.bf16.vlgmr.msra.gmra.mrb[0].mxu0 %v410_v49 }
 0x29d   : > { %v1275_v59 = vpop.f32.mrb[0].mxu0 }
 0x29e   : > { %v1973_v60 = vadd.f32 %v1275_v59, %v1174_v58  ;;  %v524_v61 = vpop.f32.mrb[1].mxu0 }
 0x29f   : > { %v1975_v62 = vadd.f32 %v1174_v58, %v524_v61  ;;  %v1276_v63 = vpop.f32.mrb[2].mxu0 }
 0x2a0   : > { %v1978_v0 = vmul.f32 0.70710677, %v1973_v60  ;;  %v1980_v1 = vadd.f32 %v1276_v63, %v1174_v58  ;;  %v527_v2 = vpop.f32.mrb[3].mxu0 }
 0x2a1   : > { %v1983_v3 = vmul.f32 0.70710677, %v1975_v62  ;;  %v1985_v4 = vadd.f32 %v1174_v58, %v527_v2 }
 0x2a2   : > { %v549_v5 = vand.u32 2147483647, %v1978_v0  ;;  %v1989_v6 = vmul.f32 0.70710677, %v1980_v1  ;;  %vm625_vm0 = vcmp.lt.f32.partialorder %v1978_v0, 0.0 }
 0x2a3   : > { %v547_v7 = vand.u32 2147483647, %v1983_v3  ;;  %v1993_v8 = vmul.f32 0.70710677, %v1985_v4  ;;  %vm623_vm1 = vcmp.lt.f32.partialorder %v1983_v3, 0.0 }
 0x2a4   : > { %v553_v9 = vmul.f32 0.3275911, %v549_v5  ;;  %v550_v10 = vand.u32 2147483647, %v1989_v6  ;;  %v601_v19 = vsub.f32 0.0, %v549_v5  ;;  %vm626_vm2 = vcmp.lt.f32.partialorder %v1989_v6, 0.0 }
 0x2a5   : > { %v551_v11 = vmul.f32 0.3275911, %v547_v7  ;;  %v548_v12 = vand.u32 2147483647, %v1993_v8  ;;  %v599_v20 = vsub.f32 0.0, %v547_v7  ;;  %vm624_vm3 = vcmp.lt.f32.partialorder %v1993_v8, 0.0 }
 0x2a6   : > { %v557_v13 = vadd.f32 1.0, %v553_v9  ;;  %v554_v14 = vmul.f32 0.3275911, %v550_v10  ;;  %v605_v22 = vmul.f32 %v601_v19, %v549_v5  ;;  %v602_v23 = vsub.f32 0.0, %v550_v10  ;;  %v1434_v8 = vld [vmem:[#allocation10 + $0x10] sm:$0xff]  }
 0x2a7   : > { %v555_v15 = vadd.f32 1.0, %v551_v11  ;;  %v552_v16 = vmul.f32 0.3275911, %v548_v12  ;;  %v603_v26 = vmul.f32 %v599_v20, %v547_v7  ;;  %v600_v27 = vsub.f32 0.0, %v548_v12 }
 0x2a8   : > { %1448 = vrcp.f32 %v557_v13  ;;  %v558_v17 = vadd.f32 1.0, %v554_v14  ;;  %v611_v31 = vmul.f32 1.442695, %v605_v22  ;;  %v606_v32 = vmul.f32 %v602_v23, %v550_v10 }
 0x2a9   : > { %1450 = vrcp.f32 %v555_v15  ;;  %v556_v18 = vadd.f32 1.0, %v552_v16  ;;  %v607_v35 = vmul.f32 1.442695, %v603_v26  ;;  %v604_v38 = vmul.f32 %v600_v27, %v548_v12 }
 0x2aa   : > { %1452 = vrcp.f32 %v558_v17  ;;  %v613_v43 = vmul.f32 1.442695, %v606_v32 }
 0x2ab   : > { %1454 = vrcp.f32 %v556_v18  ;;  %v609_v48 = vmul.f32 1.442695, %v604_v38  ;;  %v539_v38 = vmul.f32 0.5, %v1975_v62  ;;  %v1435_v62 = vld [vmem:[#allocation10 + $0x18] sm:$0xff]  }
 0x2ac   : > { %1456 = vpow2.f32 %v611_v31 }
 0x2ad   : > { %1458 = vpow2.f32 %v607_v35 }
 0x2ae   : > { %1460 = vpow2.f32 %v613_v43 }
 0x2af   : > { %1462 = vpow2.f32 %v609_v48  ;;  %v1439_v48 = vld [vmem:[#allocation10 + $0x38] sm:$0xff]  }
 0x2b2   : > { %v1449_v21 = vpop.eup %1448 }
 0x2b3   : > { %v1451_v24 = vpop.eup %1450  ;;  %v565_v25 = vmul.f32 1.0614054, %v1449_v21 }
 0x2b4   : > { %v563_v28 = vmul.f32 1.0614054, %v1451_v24  ;;  %v1453_v30 = vpop.eup %1452 }
 0x2b5   : > { %v569_v29 = vadd.f32 -1.4531521, %v565_v25  ;;  %v566_v36 = vmul.f32 1.0614054, %v1453_v30  ;;  %v1455_v37 = vpop.eup %1454 }
 0x2b6   : > { %v567_v33 = vadd.f32 -1.4531521, %v563_v28  ;;  %v564_v42 = vmul.f32 1.0614054, %v1455_v37  ;;  %v1457_v9 = vpop.eup %1456 }
 0x2b7   : > { %v573_v34 = vmul.f32 %v1449_v21, %v569_v29  ;;  %v570_v41 = vadd.f32 -1.4531521, %v566_v36  ;;  %v1459_v11 = vpop.eup %1458  ;;  %v542_v36 = vmul.f32 0.5, %v1980_v1  ;;  %v1433_v1 = vld [vmem:[#allocation10 + $0x8] sm:$0xff]  }
 0x2b8   : > { %v571_v39 = vmul.f32 %v1451_v24, %v567_v33  ;;  %v568_v47 = vadd.f32 -1.4531521, %v564_v42  ;;  %v1461_v19 = vpop.eup %1460 }
 0x2b9   : > { %v577_v40 = vadd.f32 1.4214138, %v573_v34  ;;  %v574_v46 = vmul.f32 %v1453_v30, %v570_v41  ;;  %v1463_v26 = vpop.eup %1462  ;;  %v540_v41 = vmul.f32 0.5, %v1985_v4  ;;  %v1436_v4 = vld [vmem:[#allocation10 + $0x20] sm:$0xff]  }
 0x2ba   : > { %v575_v44 = vadd.f32 1.4214138, %v571_v39  ;;  %v572_v52 = vmul.f32 %v1455_v37, %v568_v47  ;;  %v1438_v47 = vld [vmem:[#allocation10 + $0x30] sm:$0xff]  }
 0x2bb   : > { %v581_v45 = vmul.f32 %v1449_v21, %v577_v40  ;;  %v578_v51 = vadd.f32 1.4214138, %v574_v46  ;;  %v1437_v46 = vld [vmem:[#allocation10 + $0x28] sm:$0xff]  }
 0x2bc   : > { %v579_v49 = vmul.f32 %v1451_v24, %v575_v44  ;;  %v576_v56 = vadd.f32 1.4214138, %v572_v52 }
 0x2bd   : > { %v585_v50 = vadd.f32 -0.28449672, %v581_v45  ;;  %v582_v55 = vmul.f32 %v1453_v30, %v578_v51  ;;  %v1432_v45 = vld [vmem:[#allocation10] sm:$0xff]  }
 0x2be   : > { %v583_v53 = vadd.f32 -0.28449672, %v579_v49  ;;  %v580_v61 = vmul.f32 %v1455_v37, %v576_v56  ;;  %1297 = vmatprep.subr.bf16.mxu0 %v1432_v45  ;;  %v1191_v49 = vld [vmem:[%s2102_s4] ss:$0 sm:$0xff] }
 0x2bf   : > { %v589_v54 = vmul.f32 %v1449_v21, %v585_v50  ;;  %v586_v59 = vadd.f32 -0.28449672, %v582_v55  ;;  %1298 = vmatpush3.bf16.msra.mxu0 %v1432_v45 }
 0x2c0   : > { %v587_v57 = vmul.f32 %v1451_v24, %v583_v53  ;;  %v584_v7 = vadd.f32 -0.28449672, %v580_v61  ;;  %1299 = vmatprep.subr.bf16.mxu0 %v1433_v1 }
 0x2c1   : > { %v593_v58 = vadd.f32 0.2548296, %v589_v54  ;;  %v590_v5 = vmul.f32 %v1453_v30, %v586_v59 }
 0x2c2   : > { %v591_v63 = vadd.f32 0.2548296, %v587_v57  ;;  %v588_v14 = vmul.f32 %v1455_v37, %v584_v7 }
 0x2c3   : > { %v597_v2 = vmul.f32 %v1449_v21, %v593_v58  ;;  %v594_v13 = vadd.f32 0.2548296, %v590_v5  ;;  %1300 = vmatpush3.bf16.msra.mxu0 %v1433_v1 }
 0x2c4   : > { %v595_v10 = vmul.f32 %v1451_v24, %v591_v63  ;;  %v592_v18 = vadd.f32 0.2548296, %v588_v14  ;;  %1301 = vmatprep.subr.bf16.mxu0 %v1434_v8 }
 0x2c5   : > { %v617_v12 = vmul.f32 %v1457_v9, %v597_v2  ;;  %v598_v17 = vmul.f32 %v1453_v30, %v594_v13  ;;  %v541_v30 = vmul.f32 0.5, %v1973_v60 }
 0x2c6   : > { %v615_v15 = vmul.f32 %v1459_v11, %v595_v10  ;;  %v596_v25 = vmul.f32 %v1455_v37, %v592_v18 }
 0x2c7   : > { %v621_v16 = vsub.f32 1.0, %v617_v12  ;;  %v618_v23 = vmul.f32 %v1461_v19, %v598_v17  ;;  %1302 = vmatpush3.bf16.msra.mxu0 %v1434_v8 }
 0x2c8   : > { %v619_v20 = vsub.f32 1.0, %v615_v15  ;;  %v616_v24 = vmul.f32 %v1463_v26, %v596_v25  ;;  %1303 = vmatprep.subr.bf16.mxu0 %v1435_v62 }
 0x2c9   : > { %v629_v22 = vsub.f32 0.0, %v621_v16  ;;  %v622_v28 = vsub.f32 1.0, %v618_v23 }
 0x2ca   : > { %v627_v21 = vsub.f32 0.0, %v619_v20  ;;  %v620_v31 = vsub.f32 1.0, %v616_v24 }
 0x2cb   : > { %v633_v27 = vsel %vm625_vm0, %v629_v22, %v621_v16  ;;  %v630_v29 = vsub.f32 0.0, %v622_v28  ;;  %1304 = vmatpush3.bf16.msra.mxu0 %v1435_v62 }
 0x2cc   : > { %v631_v32 = vsel %vm623_vm1, %v627_v21, %v619_v20  ;;  %v637_v33 = vadd.f32 1.0, %v633_v27  ;;  %v628_v35 = vsub.f32 0.0, %v620_v31  ;;  %1305 = vmatprep.subr.bf16.mxu0 %v1436_v4 }
 0x2cd   : > { %v634_v34 = vsel %vm626_vm2, %v630_v29, %v622_v28  ;;  %v635_v0 = vadd.f32 1.0, %v631_v32 }
 0x2ce   : > { %v638_v37 = vadd.f32 1.0, %v634_v34  ;;  %v632_v39 = vsel %vm624_vm3, %v628_v35, %v620_v31  ;;  %v641_v3 = vmul.f32 %v637_v33, %v541_v30 }
 0x2cf   : > { %v636_v42 = vadd.f32 1.0, %v632_v39  ;;  %v639_v43 = vmul.f32 %v635_v0, %v539_v38  ;;  %1306 = vmatpush3.bf16.msra.mxu0 %v1436_v4 }
 0x2d0   : > { %v642_v40 = vmul.f32 %v638_v37, %v542_v36  ;;  %1307 = vmatprep.subr.bf16.mxu0 %v1437_v46 }
 0x2d1   : > { %v640_v6 = vmul.f32 %v636_v42, %v540_v41 }
 0x2d2   : > { %v648_v44 = vpack.c.bf16 %v642_v40, %v641_v3 }
 0x2d3   : > { %v647_v60 = vpack.c.bf16 %v640_v6, %v639_v43  ;;  %1308 = vmatpush3.bf16.msra.mxu0 %v1437_v46 }
 0x2d4   : > { %1309 = vmatprep.subr.bf16.mxu0 %v1438_v47 }
 0x2d5   : > { %1293 = vmatprep.mubr.bf16.mxu1 %v647_v60 }
 0x2d6   : > { %1294 = vmatmul.mubr.bf16.vlgmr.msra.gmra.mrb[0].mxu1 %v648_v44 }
 0x2d7   : > { %1310 = vmatpush3.bf16.msra.mxu0 %v1438_v47 }
 0x2d8   : > { %1311 = vmatprep.subr.bf16.mxu0 %v1439_v48 }
 0x2db   : > { %1312 = vmatpush3.bf16.msra.mxu0 %v1439_v48 }
 0x3a9   : > { %v1295_v50 = vpop.f32.mrb[0].mxu1 }
 0x3aa   : > { %v2008_v51 = vadd.f32 %v1295_v50, %v1191_v49  ;;  %v747_v52 = vpop.f32.mrb[1].mxu1 }
 0x3ab   : > { %v2010_v53 = vadd.f32 %v1191_v49, %v747_v52  ;;  %v1296_v54 = vpop.f32.mrb[2].mxu1 }
 0x3ac   : > { %v2013_v55 = vmul.f32 0.70710677, %v2008_v51  ;;  %v2015_v56 = vadd.f32 %v1296_v54, %v1191_v49  ;;  %v750_v57 = vpop.f32.mrb[3].mxu1 }
 0x3ad   : > { %v2018_v58 = vmul.f32 0.70710677, %v2010_v53  ;;  %v2020_v59 = vadd.f32 %v1191_v49, %v750_v57 }
 0x3ae   : > { %v798_v61 = vand.u32 2147483647, %v2013_v55  ;;  %v2024_v63 = vmul.f32 0.70710677, %v2015_v56  ;;  %vm874_vm4 = vcmp.lt.f32.partialorder %v2013_v55, 0.0  ;;  %v791_v55 = vmul.f32 0.5, %v2015_v56 }
 0x3af   : > { %v796_v2 = vand.u32 2147483647, %v2018_v58  ;;  %v2028_v5 = vmul.f32 0.70710677, %v2020_v59  ;;  %vm872_vm5 = vcmp.lt.f32.partialorder %v2018_v58, 0.0 }
 0x3b0   : > { %v802_v7 = vmul.f32 0.3275911, %v798_v61  ;;  %v799_v9 = vand.u32 2147483647, %v2024_v63  ;;  %v850_v18 = vsub.f32 0.0, %v798_v61  ;;  %vm875_vm6 = vcmp.lt.f32.partialorder %v2024_v63, 0.0 }
 0x3b1   : > { %v800_v10 = vmul.f32 0.3275911, %v796_v2  ;;  %v797_v11 = vand.u32 2147483647, %v2028_v5  ;;  %v848_v19 = vsub.f32 0.0, %v796_v2  ;;  %vm873_vm7 = vcmp.lt.f32.partialorder %v2028_v5, 0.0 }
 0x3b2   : > { %v806_v12 = vadd.f32 1.0, %v802_v7  ;;  %v803_v13 = vmul.f32 0.3275911, %v799_v9  ;;  %v854_v22 = vmul.f32 %v850_v18, %v798_v61  ;;  %v851_v23 = vsub.f32 0.0, %v799_v9  ;;  %v1192_v5 = vld [vmem:[%s2130_s24] ss:$0 sm:$0xff] }
 0x3b3   : > { %v804_v14 = vadd.f32 1.0, %v800_v10  ;;  %v801_v15 = vmul.f32 0.3275911, %v797_v11  ;;  %v852_v21 = vmul.f32 %v848_v19, %v796_v2  ;;  %v849_v28 = vsub.f32 0.0, %v797_v11 }
 0x3b4   : > { %1464 = vrcp.f32 %v806_v12  ;;  %v807_v16 = vadd.f32 1.0, %v803_v13  ;;  %v860_v31 = vmul.f32 1.442695, %v854_v22  ;;  %v855_v33 = vmul.f32 %v851_v23, %v799_v9 }
 0x3b5   : > { %1466 = vrcp.f32 %v804_v14  ;;  %v805_v17 = vadd.f32 1.0, %v801_v15  ;;  %v856_v34 = vmul.f32 1.442695, %v852_v21  ;;  %v853_v0 = vmul.f32 %v849_v28, %v797_v11 }
 0x3b6   : > { %1468 = vrcp.f32 %v807_v16  ;;  %v862_v41 = vmul.f32 1.442695, %v855_v33 }
 0x3b7   : > { %1470 = vrcp.f32 %v805_v17  ;;  %v858_v60 = vmul.f32 1.442695, %v853_v0 }
 0x3b8   : > { %1472 = vpow2.f32 %v860_v31 }
 0x3b9   : > { %1474 = vpow2.f32 %v856_v34 }
 0x3ba   : > { %1476 = vpow2.f32 %v862_v41 }
 0x3bb   : > { %1478 = vpow2.f32 %v858_v60 }
 0x3be   : > { %v1465_v20 = vpop.eup %1464 }
 0x3bf   : > { %v1467_v25 = vpop.eup %1466  ;;  %v814_v26 = vmul.f32 1.0614054, %v1465_v20 }
 0x3c0   : > { %v812_v27 = vmul.f32 1.0614054, %v1467_v25  ;;  %v1469_v29 = vpop.eup %1468 }
 0x3c1   : > { %v818_v24 = vadd.f32 -1.4531521, %v814_v26  ;;  %v815_v35 = vmul.f32 1.0614054, %v1469_v29  ;;  %v1471_v36 = vpop.eup %1470 }
 0x3c2   : > { %v816_v32 = vadd.f32 -1.4531521, %v812_v27  ;;  %v813_v3 = vmul.f32 1.0614054, %v1471_v36  ;;  %v1473_v7 = vpop.eup %1472 }
 0x3c3   : > { %v822_v30 = vmul.f32 %v1465_v20, %v818_v24  ;;  %v819_v39 = vadd.f32 -1.4531521, %v815_v35  ;;  %v1475_v10 = vpop.eup %1474 }
 0x3c4   : > { %v820_v37 = vmul.f32 %v1467_v25, %v816_v32  ;;  %v817_v6 = vadd.f32 -1.4531521, %v813_v3  ;;  %v1477_v18 = vpop.eup %1476 }
 0x3c5   : > { %v826_v38 = vadd.f32 1.4214138, %v822_v30  ;;  %v823_v43 = vmul.f32 %v1469_v29, %v819_v39  ;;  %v1479_v21 = vpop.eup %1478  ;;  %v789_v39 = vmul.f32 0.5, %v2020_v59 }
 0x3c6   : > { %v824_v40 = vadd.f32 1.4214138, %v820_v37  ;;  %v821_v8 = vmul.f32 %v1471_v36, %v817_v6  ;;  %v788_v37 = vmul.f32 0.5, %v2010_v53 }
 0x3c7   : > { %v830_v42 = vmul.f32 %v1465_v20, %v826_v38  ;;  %v827_v1 = vadd.f32 1.4214138, %v823_v43 }
 0x3c8   : > { %v828_v44 = vmul.f32 %v1467_v25, %v824_v40  ;;  %v825_v47 = vadd.f32 1.4214138, %v821_v8 }
 0x3c9   : > { %v834_v45 = vadd.f32 -0.28449672, %v830_v42  ;;  %v831_v46 = vmul.f32 %v1469_v29, %v827_v1 }
 0x3ca   : > { %v832_v62 = vadd.f32 -0.28449672, %v828_v44  ;;  %v829_v52 = vmul.f32 %v1471_v36, %v825_v47 }
 0x3cb   : > { %v838_v4 = vmul.f32 %v1465_v20, %v834_v45  ;;  %v835_v50 = vadd.f32 -0.28449672, %v831_v46 }
 0x3cc   : > { %v836_v48 = vmul.f32 %v1467_v25, %v832_v62  ;;  %v833_v2 = vadd.f32 -0.28449672, %v829_v52 }
 0x3cd   : > { %v842_v49 = vadd.f32 0.2548296, %v838_v4  ;;  %v839_v61 = vmul.f32 %v1469_v29, %v835_v50 }
 0x3ce   : > { %v840_v54 = vadd.f32 0.2548296, %v836_v48  ;;  %v837_v13 = vmul.f32 %v1471_v36, %v833_v2 }
 0x3cf   : > { %v846_v57 = vmul.f32 %v1465_v20, %v842_v49  ;;  %v843_v12 = vadd.f32 0.2548296, %v839_v61 }
 0x3d0   : > { %v844_v9 = vmul.f32 %v1467_v25, %v840_v54  ;;  %v841_v17 = vadd.f32 0.2548296, %v837_v13 }
 0x3d1   : > { %v866_v11 = vmul.f32 %v1473_v7, %v846_v57  ;;  %v847_v16 = vmul.f32 %v1469_v29, %v843_v12  ;;  %v790_v29 = vmul.f32 0.5, %v2008_v51 }
 0x3d2   : > { %v864_v14 = vmul.f32 %v1475_v10, %v844_v9  ;;  %v845_v26 = vmul.f32 %v1471_v36, %v841_v17 }
 0x3d3   : > { %v870_v15 = vsub.f32 1.0, %v866_v11  ;;  %v867_v23 = vmul.f32 %v1477_v18, %v847_v16 }
 0x3d4   : > { %v868_v19 = vsub.f32 1.0, %v864_v14  ;;  %v865_v25 = vmul.f32 %v1479_v21, %v845_v26 }
 0x3d5   : > { %v878_v22 = vsub.f32 0.0, %v870_v15  ;;  %v871_v28 = vsub.f32 1.0, %v867_v23 }
 0x3d6   : > { %v876_v20 = vsub.f32 0.0, %v868_v19  ;;  %v869_v32 = vsub.f32 1.0, %v865_v25 }
 0x3d7   : > { %v882_v27 = vsel %vm874_vm4, %v878_v22, %v870_v15  ;;  %v879_v31 = vsub.f32 0.0, %v871_v28 }
 0x3d8   : > { %v880_v24 = vsel %vm872_vm5, %v876_v20, %v868_v19  ;;  %v886_v33 = vadd.f32 1.0, %v882_v27  ;;  %v877_v34 = vsub.f32 0.0, %v869_v32 }
 0x3d9   : > { %v883_v30 = vsel %vm875_vm6, %v879_v31, %v871_v28  ;;  %v884_v35 = vadd.f32 1.0, %v880_v24 }
 0x3da   : > { %v887_v36 = vadd.f32 1.0, %v883_v30  ;;  %v881_v58 = vsel %vm873_vm7, %v877_v34, %v869_v32  ;;  %v890_v0 = vmul.f32 %v886_v33, %v790_v29 }
 0x3db   : > { %v885_v63 = vadd.f32 1.0, %v881_v58  ;;  %v888_v3 = vmul.f32 %v884_v35, %v788_v37 }
 0x3dc   : > { %v891_v38 = vmul.f32 %v887_v36, %v791_v55 }
 0x3dd   : > { %v889_v40 = vmul.f32 %v885_v63, %v789_v39 }
 0x3de   : > { %v893_v51 = vpack.c.bf16 %v891_v38, %v890_v0 }
 0x3df   : > { %v892_v41 = vpack.c.bf16 %v889_v40, %v888_v3 }
 0x3e1   : > { %1313 = vmatprep.mubr.bf16.mxu0 %v892_v41 }
 0x3e2   : > { %1314 = vmatmul.mubr.bf16.vlgmr.msra.gmra.mrb[4].mxu0 %v893_v51 }
 0x4b5   : > { %v1315_v56 = vpop.f32.mrb[4].mxu0 }
 0x4b6   : > { %v999_v53 = vpop.f32.mrb[5].mxu0  ;;  %v1008_v59 = vadd.f32 %v1315_v56, %v1192_v5 }
 0x4b7   : > { %v1316_v42 = vpop.f32.mrb[6].mxu0  ;;  %v1000_v44 = vadd.f32 %v1192_v5, %v999_v53 }
 0x4b8   : > { %v1011_v43 = vadd.f32 %v1316_v42, %v1192_v5  ;;  %v1002_v6 = vpop.f32.mrb[7].mxu0 }
 0x4b9   : > { %v1003_v60 = vadd.f32 %v1192_v5, %v1002_v6 }
 0x4ba   : > { %v1224_v45 = vpack.c.bf16 %v1011_v43, %v1008_v59 }
 0x4bb   : > { %v1219_v1 = vpack.c.bf16 %v1003_v60, %v1000_v44 }
 0x4bc   : > { %1226 = vst [vmem:[%s352_s30 + $0x8] sm:$0xff] %v1224_v45  }
 0x4bd   : > { %1220 = vst [vmem:[%s352_s30] sm:$0xff] %v1219_v1  }
 0x4be   : > { %1607 = shalt.err (!%p1604_p13)
}
 0x4bf   : > { %s1608_s10 = scalar_lea.hbm %s2050_s20, 256  ;;  %s1612_s15 = scalar_lea.hbm %s2131_s12, 1024 }
 0x4c0   : > { %p1609_p4 = scmp.ne.s32.totalorder %s2050_s20, %s1608_s10  ;;  %p1613_p11 = scmp.lt.u32.totalorder %s2050_s20, %s2131_s12 }
 0x4c1   : > { %p1614_p1 = scmp.lt.u32.totalorder %s1612_s15, %s1608_s10  ;;  %p1616_p10 = scmp.lt.u32.totalorder %s1608_s10, %s2050_s20 }
 0x4c2   : > { %p1610_p2 = pnand %p1609_p4, %p1896_p0 }
 0x4c3   : > { %p1615_p12 = por %p1614_p1, %p1613_p11 }
 0x4c4   : > { %p1611_p8 = pneg %p1610_p2 }
 0x4c5   : > { %p1617_p6 = por %p1616_p10, %p1615_p12 }
 0x4c7   : > { %p1618_p3 = pnand %p1617_p6, %p1611_p8 }
 0x4c9   : > { %1621 = shalt.err (!%p1618_p3)
}
 0x4ca   : > { %s1695_s17 = smov 64   ;;  %s1696_s18 = smov 4  }
 0x4cb   : > { %1331 = dma.vmem_to_hbm [thread:$0]  (%p1896_p0), %s2045_s8, 256, %s2050_s20, %s1035_s27, %s1695_s17, %s1695_s17, %s1696_s18  }
 0x4cc PF: > { %s2132_s6 = sld [smem:[#allocation17_spill]]  ;;  %s2133_s22 = sld [smem:[#allocation18_spill]] }
 0x4cd   : > { %p1358_p5 = scmp.ge.s32.totalorder %s1684_s29, 2 }
 0x4d2   : > { %s1063_s9 = sand.u32 1, %s2132_s6   ;;  %p2134_p7 = scmp.ne.s32.totalorder %s2133_s22, 0 }
 0x4d3   : > { %s1064_s11 = scalar_lea.sflag [#allocation6], %s1063_s9 }
 0x4d4   : > { %p1348_p9 = pnand %p1358_p5, %p2134_p7 }
 0x4d6   : > { %1659 = dma.done.wait (!%p1348_p9), %s1064_s11, 256  }
 0x4d7   : > { %1661 = vsyncadd (!%p1348_p9), %s1064_s11, 4294967040  ;;  %s25_s29 = sadd.s32 1, %s1684_s29   ;;  %s2135_s24 = smov %s1668_s25 }
 0x4d8   : > { %p22_p13 = scmp.ge.s32.totalorder %s25_s29, 6   ;;  %s2136_s25 = smov %s1672_s26 }
 0x4d9   : > { %s2137_s26 = smov %s1908_s23  ;;  %s2138_s27 = smov %s1680_s28 }
 0x4da   : > { %s2139_s28 = smov %s2141_s16  ;;  %24 = sbr.rel (!%p22_p13) target bundleno = 11 (0xb), region = 113 }
 0x4e1   :  { %1069 = vsyncpa [#allocation5], 1 }
 0x4e2   :  { %1071 = vsyncpa [#allocation5 + $0x1], 1 }
 0x4e3   :  { %1072 = vsyncpa [#allocation8], 1 }
 0x4e4   :  { %1073 = vsyncpa [#allocation11], 1 }
 0x4e5   :  { %1074 = vsyncpa [#allocation6], 1 }
 0x4e6   :  { %1076 = vsyncpa [#allocation6 + $0x1], 1 }

</bundles_post_ra>
